<compile_context>
chip_gen: v5e
topology: v5e:2x2
jax: 0.10.0
libtpu: 0.0.40
codegen_flags: <defaults>
</compile_context>

<pallas_src>
import functools

import jax
import jax.numpy as jnp
from jax.experimental import pallas as pl
from jax.experimental.pallas import tpu as pltpu

NUM_FEATURES = 4
NUM_CLASSES = 3
HIDDEN1 = 16          # conv1 out channels
HIDDEN2 = 32          # conv2 out channels
FC1 = 64
EDGE_MLP_HIDDEN = 10

# Lane-aligned padded sizes (padded weights/biases are zero, so padded lanes stay exactly
# zero through ELU and never contaminate real outputs).
CIN_PAD = 128         # node feature lanes
COUT_PAD = 128        # conv output lanes (16 / 32 padded to 128 -> lane-dense outputs)
H_PAD = 16            # edge-MLP hidden (10 -> 16)
FC1_PAD = 128
CLS_PAD = 128


def _vmem_limit_bytes():
    # v5e/v6e: 128 MiB physical -> 48 MiB budget; v7x: 64 MiB per TC -> 32 MiB budget.
    cap = 128 * 1024 * 1024
    try:
        cap = int(getattr(pltpu.get_tpu_info(), "vmem_capacity_bytes", cap))
    except Exception:
        pass
    return min(48 * 1024 * 1024, cap // 2)


VMEM_LIMIT = _vmem_limit_bytes()


def _round_up(a, b):
    return ((a + b - 1) // b) * b


def _pad2(a, rows, cols):
    return jnp.pad(a, ((0, rows - a.shape[0]), (0, cols - a.shape[1])))


def _elu(v):
    # ELU(alpha=1): x if x > 0 else exp(x) - 1
    return jnp.where(v > 0, v, jnp.expm1(jnp.minimum(v, 0.0)))


# --------------------------------------------------------------------------------------
# Message kernel: grid = (edge_blocks,) [parallel]
# Computes, per edge block: edge MLP -> theta slices, gather x_src = G@x, msg (bf16).
# --------------------------------------------------------------------------------------
def message_kernel(x_ref, ea_ref, g_ref, wa_ref, ba_ref, wb_ref, bb_ref,
                   msg_ref, *, cin):
    # Edge MLP first layer (K=1): VPU outer product in f32.
    ea = ea_ref[...]                                              # [e_blk, 1]
    h = jnp.maximum(ea * wa_ref[...] + ba_ref[...], 0.0)          # [e_blk, H_PAD]
    h_bf = h.astype(jnp.bfloat16)

    # Gather source-node features: bf16 0/1 select (exact), f32 accumulation.
    x_src = jnp.dot(g_ref[...], x_ref[...],
                    preferred_element_type=jnp.float32)           # [e_blk, CIN_PAD]

    # Per-input-channel theta slice computed on the fly and FMA'd into msg
    # (never materializes the [e_blk, cin*128] theta slab; slices stay 128-lane aligned).
    msg = None
    for f in range(cin):
        theta_f = (jnp.dot(h_bf, wb_ref[:, f * COUT_PAD:(f + 1) * COUT_PAD],
                           preferred_element_type=jnp.float32)
                   + bb_ref[:, f * COUT_PAD:(f + 1) * COUT_PAD])  # [e_blk, COUT_PAD]
        term = x_src[:, f:f + 1] * theta_f
        msg = term if msg is None else msg + term
    msg_ref[...] = msg.astype(jnp.bfloat16)


def _message_call(x_bf16, ea, G, wa, ba, wb_bf16, bb, *, cin, e_blk):
    n_pad = x_bf16.shape[0]
    e_pad = G.shape[0]
    nb_e = e_pad // e_blk
    tw = cin * COUT_PAD

    flops = (2 * e_pad * n_pad * CIN_PAD       # G @ x
             + 2 * e_pad * H_PAD * tw          # edge MLP second layer
             + 3 * e_pad * tw)                 # message FMA (VPU)
    bytes_accessed = (G.size * 2 + x_bf16.size * 2 + ea.size * 4
                      + wb_bf16.size * 2 + bb.size * 4 + e_pad * COUT_PAD * 2)

    grid_spec = pltpu.PrefetchScalarGridSpec(
        num_scalar_prefetch=0,
        grid=(nb_e,),
        in_specs=[
            pl.BlockSpec((n_pad, CIN_PAD), lambda k: (0, 0)),   # x (bf16, full, gather operand)
            pl.BlockSpec((e_blk, 1), lambda k: (k, 0)),         # edge_attr
            pl.BlockSpec((e_blk, n_pad), lambda k: (k, 0)),     # G (bf16 0/1)
            pl.BlockSpec((1, H_PAD), lambda k: (0, 0)),         # wa
            pl.BlockSpec((1, H_PAD), lambda k: (0, 0)),         # ba
            pl.BlockSpec((H_PAD, tw), lambda k: (0, 0)),        # wb (bf16)
            pl.BlockSpec((1, tw), lambda k: (0, 0)),            # bb
        ],
        out_specs=pl.BlockSpec((e_blk, COUT_PAD), lambda k: (k, 0)),
    )
    return pl.pallas_call(
        functools.partial(message_kernel, cin=cin),
        out_shape=jax.ShapeDtypeStruct((e_pad, COUT_PAD), jnp.bfloat16),
        grid_spec=grid_spec,
        compiler_params=pltpu.CompilerParams(
            dimension_semantics=("parallel",),
            vmem_limit_bytes=VMEM_LIMIT),
        cost_estimate=pl.CostEstimate(flops=int(flops), transcendentals=0,
                                      bytes_accessed=int(bytes_accessed)),
    )(x_bf16, ea, G, wa, ba, wb_bf16, bb)


# --------------------------------------------------------------------------------------
# Scatter/conv kernel: grid = (node_blocks [parallel], edge_blocks [arbitrary/reduction])
# acc += A @ msg; finalize: mean scale + root term + bias + ELU.
# With with_pool=True (conv2), the only output is the per-node-block pooled partial
# P_blk @ h  -> [B_pad, COUT_PAD] (global_mean_pool fused; h2 never hits HBM).
# --------------------------------------------------------------------------------------
def conv_kernel(*refs, with_pool):
    if with_pool:
        (xr_ref, msg_ref, a_ref, invdeg_ref, root_ref, bias_ref, p_ref,
         pool_ref, acc_ref) = refs
    else:
        (xr_ref, msg_ref, a_ref, invdeg_ref, root_ref, bias_ref,
         out_ref, acc_ref) = refs

    k = pl.program_id(1)

    @pl.when(k == 0)
    def _():
        acc_ref[...] = jnp.zeros_like(acc_ref)

    # Scatter-sum into the node accumulator (mean scaling applied at finalize, in f32).
    acc_ref[...] += jnp.dot(a_ref[...], msg_ref[...],
                            preferred_element_type=jnp.float32)   # [n_blk, COUT_PAD]

    @pl.when(k == pl.num_programs(1) - 1)
    def _():
        lin = (acc_ref[...] * invdeg_ref[...]                     # mean aggregation
               + jnp.dot(xr_ref[...], root_ref[...],
                         preferred_element_type=jnp.float32)
               + bias_ref[...])
        h = _elu(lin)
        h_bf = h.astype(jnp.bfloat16)
        if with_pool:
            # Per-node-block pooled partial (0/1 bf16 select, f32 accumulation).
            pool_ref[...] = jnp.dot(p_ref[...], h_bf,
                                    preferred_element_type=jnp.float32)
        else:
            out_ref[...] = h_bf


def _conv_call(x_bf16, msg, A, inv_deg, root_bf16, bias, P=None, *, n_blk, e_blk):
    n_pad = x_bf16.shape[0]
    e_pad = msg.shape[0]
    nb_n = n_pad // n_blk
    nb_e = e_pad // e_blk
    with_pool = P is not None

    flops = (2 * n_pad * e_pad * COUT_PAD          # A @ msg
             + 2 * n_pad * CIN_PAD * COUT_PAD)     # root term
    bytes_accessed = (A.size * 2 + nb_n * msg.size * 2 + x_bf16.size * 2
                      + root_bf16.size * 2 + bias.size * 4 + inv_deg.size * 4)

    in_specs = [
        pl.BlockSpec((n_blk, CIN_PAD), lambda i, k: (i, 0)),     # x node block (root term)
        pl.BlockSpec((e_blk, COUT_PAD), lambda i, k: (k, 0)),    # msg (bf16)
        pl.BlockSpec((n_blk, e_blk), lambda i, k: (i, k)),       # A (bf16 0/1)
        pl.BlockSpec((n_blk, 1), lambda i, k: (i, 0)),           # 1/deg (f32)
        pl.BlockSpec((CIN_PAD, COUT_PAD), lambda i, k: (0, 0)),  # root (bf16)
        pl.BlockSpec((1, COUT_PAD), lambda i, k: (0, 0)),        # bias (f32)
    ]
    inputs = [x_bf16, msg, A, inv_deg, root_bf16, bias]

    if with_pool:
        b_pad = P.shape[0]
        in_specs.append(pl.BlockSpec((b_pad, n_blk), lambda i, k: (0, i)))   # P (bf16 0/1)
        inputs.append(P)
        flops += 2 * b_pad * n_pad * COUT_PAD
        bytes_accessed += P.size * 2 + nb_n * b_pad * COUT_PAD * 4
        out_specs = pl.BlockSpec((None, b_pad, COUT_PAD), lambda i, k: (i, 0, 0))
        out_shape = jax.ShapeDtypeStruct((nb_n, b_pad, COUT_PAD), jnp.float32)
    else:
        bytes_accessed += n_pad * COUT_PAD * 2
        out_specs = pl.BlockSpec((n_blk, COUT_PAD), lambda i, k: (i, 0))
        out_shape = jax.ShapeDtypeStruct((n_pad, COUT_PAD), jnp.bfloat16)

    grid_spec = pltpu.PrefetchScalarGridSpec(
        num_scalar_prefetch=0,
        grid=(nb_n, nb_e),
        in_specs=in_specs,
        out_specs=out_specs,
        scratch_shapes=[pltpu.VMEM((n_blk, COUT_PAD), jnp.float32)],
    )
    return pl.pallas_call(
        functools.partial(conv_kernel, with_pool=with_pool),
        out_shape=out_shape,
        grid_spec=grid_spec,
        compiler_params=pltpu.CompilerParams(
            dimension_semantics=("parallel", "arbitrary"),
            vmem_limit_bytes=VMEM_LIMIT),
        cost_estimate=pl.CostEstimate(flops=int(flops),
                                      transcendentals=int(n_pad * COUT_PAD),
                                      bytes_accessed=int(bytes_accessed)),
    )(*inputs)


# --------------------------------------------------------------------------------------
# Head kernel (single step): mean scaling -> fc1 -> ELU -> fc2 -> masked log_softmax
# Input is the already-pooled [B_pad, COUT_PAD] slab (partials summed on the wrapper side).
# --------------------------------------------------------------------------------------
def head_kernel(xp_ref, invc_ref, wf1_ref, bf1_ref, wf2_ref, bf2_ref, out_ref):
    xp = xp_ref[...] * invc_ref[...]                               # mean pool (f32 scale)
    z1 = _elu(jnp.dot(xp, wf1_ref[...],
                      preferred_element_type=jnp.float32) + bf1_ref[...])
    logits = jnp.dot(z1, wf2_ref[...],
                     preferred_element_type=jnp.float32) + bf2_ref[...]
    lane = jax.lax.broadcasted_iota(jnp.int32, logits.shape, 1)
    mask = lane < NUM_CLASSES
    # NOTE: -1e30 mask constant is only safe while logits stay f32.
    lm = jnp.where(mask, logits, jnp.full_like(logits, -1e30))
    m = jnp.max(lm, axis=1, keepdims=True)
    ex = jnp.where(mask, jnp.exp(lm - m), 0.0)
    lse = jnp.log(jnp.sum(ex, axis=1, keepdims=True)) + m
    out_ref[...] = jnp.where(mask, lm - lse, 0.0)


def _head_call(pooled, inv_cnt, wf1, bf1, wf2, bf2):
    b_pad = pooled.shape[0]
    grid_spec = pltpu.PrefetchScalarGridSpec(
        num_scalar_prefetch=0,
        grid=(1,),
        in_specs=[
            pl.BlockSpec((b_pad, COUT_PAD), lambda j: (0, 0)),
            pl.BlockSpec((b_pad, 1), lambda j: (0, 0)),
            pl.BlockSpec((COUT_PAD, FC1_PAD), lambda j: (0, 0)),
            pl.BlockSpec((1, FC1_PAD), lambda j: (0, 0)),
            pl.BlockSpec((FC1_PAD, CLS_PAD), lambda j: (0, 0)),
            pl.BlockSpec((1, CLS_PAD), lambda j: (0, 0)),
        ],
        out_specs=pl.BlockSpec((b_pad, CLS_PAD), lambda j: (0, 0)),
    )
    return pl.pallas_call(
        head_kernel,
        out_shape=jax.ShapeDtypeStruct((b_pad, CLS_PAD), jnp.float32),
        grid_spec=grid_spec,
        compiler_params=pltpu.CompilerParams(
            dimension_semantics=("arbitrary",),
            vmem_limit_bytes=VMEM_LIMIT),
    )(pooled, inv_cnt, wf1, bf1, wf2, bf2)


# --------------------------------------------------------------------------------------
# Glue: padding, 0/1 operator construction, weight padding
# --------------------------------------------------------------------------------------
def _pad_conv_weights(wa, ba, wb, bb, root, bias, cin, cout):
    hid = wa.shape[1]
    wa_p = _pad2(wa, 1, H_PAD)
    ba_p = _pad2(ba, 1, H_PAD)
    wb3 = jnp.pad(wb.reshape(hid, cin, cout),
                  ((0, H_PAD - hid), (0, 0), (0, COUT_PAD - cout)))
    wb_p = wb3.reshape(H_PAD, cin * COUT_PAD).astype(jnp.bfloat16)
    bb3 = jnp.pad(bb.reshape(1, cin, cout), ((0, 0), (0, 0), (0, COUT_PAD - cout)))
    bb_p = bb3.reshape(1, cin * COUT_PAD)
    root_p = _pad2(root, CIN_PAD, COUT_PAD).astype(jnp.bfloat16)
    bias_p = _pad2(bias, 1, COUT_PAD)
    return wa_p, ba_p, wb_p, bb_p, root_p, bias_p


def net_forward(x, edge_index, edge_attr, batch, params, num_graphs):
    (w1a, b1a, w1b, b1b, r1, bi1,
     w2a, b2a, w2b, b2b, r2, bi2,
     wf1, bf1, wf2, bf2) = params

    N = x.shape[0]
    E = edge_index.shape[1]

    # Bigger blocks amortize ~0.35 us per grid step; stay lane-aligned.
    n_blk = 128 if N <= 128 else (256 if N <= 2048 else 512)
    N_pad = _round_up(N, n_blk)
    e_blk = min(1024, _round_up(E, 128))
    E_pad = _round_up(E, e_blk)
    B_pad = max(8, _round_up(num_graphs, 8))

    src, tgt = edge_index[0], edge_index[1]

    # Pure 0/1 operators in bf16 (exact); 1/deg and 1/count factored out, kept in f32.
    G = _pad2(jax.nn.one_hot(src, N_pad, dtype=jnp.bfloat16), E_pad, N_pad)      # [E_pad, N_pad]
    A = _pad2(jax.nn.one_hot(tgt, N_pad, dtype=jnp.bfloat16), E_pad, N_pad).T    # [N_pad, E_pad]
    deg = jnp.sum(jax.nn.one_hot(tgt, N_pad, dtype=jnp.float32), axis=0)
    inv_deg = (1.0 / jnp.maximum(deg, 1.0)).reshape(N_pad, 1)
    P = _pad2(jax.nn.one_hot(batch, B_pad, dtype=jnp.bfloat16), N_pad, B_pad).T  # [B_pad, N_pad]
    cnt = jnp.sum(jax.nn.one_hot(batch, B_pad, dtype=jnp.float32), axis=0)
    inv_cnt = (1.0 / jnp.maximum(cnt, 1.0)).reshape(B_pad, 1)

    ea = _pad2(edge_attr.astype(jnp.float32), E_pad, 1)
    # Single bf16 copy of x feeds both the gather and the root term.
    x_bf = _pad2(x.astype(jnp.float32), N_pad, CIN_PAD).astype(jnp.bfloat16)

    w1a_p, b1a_p, w1b_p, b1b_p, r1_p, bi1_p = _pad_conv_weights(
        w1a, b1a, w1b, b1b, r1, bi1, cin=NUM_FEATURES, cout=HIDDEN1)
    w2a_p, b2a_p, w2b_p, b2b_p, r2_p, bi2_p = _pad_conv_weights(
        w2a, b2a, w2b, b2b, r2, bi2, cin=HIDDEN1, cout=HIDDEN2)
    wf1_p = _pad2(wf1, COUT_PAD, FC1_PAD)
    bf1_p = _pad2(bf1, 1, FC1_PAD)
    wf2_p = _pad2(wf2, FC1_PAD, CLS_PAD)
    bf2_p = _pad2(bf2, 1, CLS_PAD)

    # Layer 1: messages once per edge block, then scatter/root/ELU -> bf16 h1.
    msg1 = _message_call(x_bf, ea, G, w1a_p, b1a_p, w1b_p, b1b_p,
                         cin=NUM_FEATURES, e_blk=e_blk)
    h1 = _conv_call(x_bf, msg1, A, inv_deg, r1_p, bi1_p, None,
                    n_blk=n_blk, e_blk=e_blk)

    # Layer 2: same, with global_mean_pool fused into the finalize (h2 never hits HBM).
    msg2 = _message_call(h1, ea, G, w2a_p, b2a_p, w2b_p, b2b_p,
                         cin=HIDDEN1, e_blk=e_blk)
    pool_parts = _conv_call(h1, msg2, A, inv_deg, r2_p, bi2_p, P,
                            n_blk=n_blk, e_blk=e_blk)           # [nb_n, B_pad, COUT_PAD]
    pooled = jnp.sum(pool_parts, axis=0)                        # tiny XLA reduce over blocks

    out_pad = _head_call(pooled, inv_cnt, wf1_p, bf1_p, wf2_p, bf2_p)
    return out_pad[:num_graphs, :NUM_CLASSES]


# --------------------------------------------------------------------------------------
# Synthetic params + pure-JAX f32 reference
# --------------------------------------------------------------------------------------
def init_params(key):
    ks = jax.random.split(key, 16)

    def lin(k, fan_in, fan_out):
        return (jax.random.normal(k, (fan_in, fan_out), jnp.float32) * 0.2).astype(jnp.float32)

    def bias(k, fan_out):
        return (jax.random.normal(k, (1, fan_out), jnp.float32) * 0.05).astype(jnp.float32)

    params = [
        lin(ks[0], 1, EDGE_MLP_HIDDEN), bias(ks[1], EDGE_MLP_HIDDEN),
        lin(ks[2], EDGE_MLP_HIDDEN, NUM_FEATURES * HIDDEN1), bias(ks[3], NUM_FEATURES * HIDDEN1),
        lin(ks[4], NUM_FEATURES, HIDDEN1), bias(ks[5], HIDDEN1),
        lin(ks[6], 1, EDGE_MLP_HIDDEN), bias(ks[7], EDGE_MLP_HIDDEN),
        lin(ks[8], EDGE_MLP_HIDDEN, HIDDEN1 * HIDDEN2), bias(ks[9], HIDDEN1 * HIDDEN2),
        lin(ks[10], HIDDEN1, HIDDEN2), bias(ks[11], HIDDEN2),
        lin(ks[12], HIDDEN2, FC1), bias(ks[13], FC1),
        lin(ks[14], FC1, NUM_CLASSES), bias(ks[15], NUM_CLASSES),
    ]
    return params


def reference_forward(x, edge_index, edge_attr, batch, params, num_graphs):
    (w1a, b1a, w1b, b1b, r1, bb1,
     w2a, b2a, w2b, b2b, r2, bb2,
     wf1, bf1, wf2, bf2) = params
    src, tgt = edge_index[0], edge_index[1]

    def elu(v):
        return jnp.where(v > 0, v, jnp.expm1(jnp.minimum(v, 0.0)))

    def nnconv(h, wa, ba, wb, bb, root, b):
        cin, cout = root.shape
        th = jnp.maximum(edge_attr @ wa + ba, 0.0) @ wb + bb
        th = th.reshape(-1, cin, cout)
        msg = jnp.einsum("ef,efc->ec", h[src], th)
        s = jax.ops.segment_sum(msg, tgt, num_segments=h.shape[0])
        cnt = jax.ops.segment_sum(jnp.ones_like(tgt, jnp.float32), tgt, num_segments=h.shape[0])
        agg = s / jnp.maximum(cnt, 1.0)[:, None]
        return agg + h @ root + b

    h1 = elu(nnconv(x, w1a, b1a, w1b, b1b, r1, bb1))
    h2 = elu(nnconv(h1, w2a, b2a, w2b, b2b, r2, bb2))
    s = jax.ops.segment_sum(h2, batch, num_segments=num_graphs)
    cnt = jax.ops.segment_sum(jnp.ones_like(batch, jnp.float32), batch, num_segments=num_graphs)
    xp = s / jnp.maximum(cnt, 1.0)[:, None]
    z1 = elu(xp @ wf1 + bf1)
    logits = z1 @ wf2 + bf2
    return jax.nn.log_softmax(logits, axis=1)


if __name__ == "__main__":
    key = jax.random.PRNGKey(0)
    k_x, k_ea, k_src, k_tgt, k_par = jax.random.split(key, 5)

    N, E, B = 12, 24, 2  # nodes, edges, graphs
    x = jax.random.normal(k_x, (N, NUM_FEATURES), jnp.float32)
    edge_attr = jax.random.normal(k_ea, (E, 1), jnp.float32)
    # keep edges within each graph (first 6 nodes = graph 0, last 6 = graph 1)
    src0 = jax.random.randint(k_src, (E // 2,), 0, N // 2)
    tgt0 = jax.random.randint(k_tgt, (E // 2,), 0, N // 2)
    src = jnp.concatenate([src0, src0 + N // 2])
    tgt = jnp.concatenate([tgt0, tgt0 + N // 2])
    edge_index = jnp.stack([src, tgt]).astype(jnp.int32)
    batch = jnp.concatenate([jnp.zeros(N // 2, jnp.int32), jnp.ones(N // 2, jnp.int32)])

    params = init_params(k_par)

    out = net_forward(x, edge_index, edge_attr, batch, params, B)
    out = jax.block_until_ready(out)

    ref = reference_forward(x, edge_index, edge_attr, batch, params, B)
    # bf16 gather/scatter/pool/root operands (f32 accumulation) -> small bounded rounding error.
    if not bool(jnp.allclose(out, ref, atol=8e-2, rtol=8e-2)):
        raise AssertionError("Pallas kernel output does not match JAX reference")

    print("KERNEL_OK")
</pallas_src>

<mosaic_0001>
module attributes {stable_mosaic.version = 11 : i64} {
  func.func @message_kernel(%arg0: i32, %arg1: memref<128x128xbf16, #tpu.memory_space<vmem>>, %arg2: memref<128x1xf32, #tpu.memory_space<vmem>>, %arg3: memref<128x128xbf16, #tpu.memory_space<vmem>>, %arg4: memref<1x16xf32, #tpu.memory_space<vmem>>, %arg5: memref<1x16xf32, #tpu.memory_space<vmem>>, %arg6: memref<16x512xbf16, #tpu.memory_space<vmem>>, %arg7: memref<1x512xf32, #tpu.memory_space<vmem>>, %arg8: memref<128x128xbf16, #tpu.memory_space<vmem>>) attributes {dimension_semantics = [#tpu.dimension_semantics<parallel>], iteration_bounds = array<i64: 1>, scalar_prefetch = 0 : i64, scratch_operands = 0 : i64, tpu.core_type = #tpu.core_type<tc>, window_params = [{pipeline_mode = #tpu.pipeline_mode<synchronous>, transform_indices = @transform_0, window_bounds = array<i64: 128, 128>}, {transform_indices = @transform_1, window_bounds = array<i64: 128, 1>}, {transform_indices = @transform_2, window_bounds = array<i64: 128, 128>}, {pipeline_mode = #tpu.pipeline_mode<synchronous>, transform_indices = @transform_3, window_bounds = array<i64: 1, 16>}, {pipeline_mode = #tpu.pipeline_mode<synchronous>, transform_indices = @transform_4, window_bounds = array<i64: 1, 16>}, {pipeline_mode = #tpu.pipeline_mode<synchronous>, transform_indices = @transform_5, window_bounds = array<i64: 16, 512>}, {pipeline_mode = #tpu.pipeline_mode<synchronous>, transform_indices = @transform_6, window_bounds = array<i64: 1, 512>}, {transform_indices = @transform_7, window_bounds = array<i64: 128, 128>}]} {
    %c0 = arith.constant 0 : index
    %c0_0 = arith.constant 0 : index
    %0 = vector.load %arg2[%c0, %c0_0] : memref<128x1xf32, #tpu.memory_space<vmem>>, vector<128x1xf32>
    %c0_1 = arith.constant 0 : index
    %c0_2 = arith.constant 0 : index
    %1 = vector.load %arg4[%c0_1, %c0_2] : memref<1x16xf32, #tpu.memory_space<vmem>>, vector<1x16xf32>
    %2 = vector.broadcast %0 : vector<128x1xf32> to vector<128x16xf32>
    %3 = vector.broadcast %1 : vector<1x16xf32> to vector<128x16xf32>
    %4 = arith.mulf %2, %3 : vector<128x16xf32>
    %c0_3 = arith.constant 0 : index
    %c0_4 = arith.constant 0 : index
    %5 = vector.load %arg5[%c0_3, %c0_4] : memref<1x16xf32, #tpu.memory_space<vmem>>, vector<1x16xf32>
    %6 = vector.broadcast %5 : vector<1x16xf32> to vector<128x16xf32>
    %7 = arith.addf %4, %6 : vector<128x16xf32>
    %cst = arith.constant 0.000000e+00 : f32
    %8 = vector.broadcast %cst : f32 to vector<128x16xf32>
    %9 = arith.maximumf %7, %8 : vector<128x16xf32>
    %10 = arith.truncf %9 : vector<128x16xf32> to vector<128x16xbf16>
    %c0_5 = arith.constant 0 : index
    %c0_6 = arith.constant 0 : index
    %11 = vector.load %arg3[%c0_5, %c0_6] : memref<128x128xbf16, #tpu.memory_space<vmem>>, vector<128x128xbf16>
    %c0_7 = arith.constant 0 : index
    %c0_8 = arith.constant 0 : index
    %12 = vector.load %arg1[%c0_7, %c0_8] : memref<128x128xbf16, #tpu.memory_space<vmem>>, vector<128x128xbf16>
    %cst_9 = arith.constant dense<0.000000e+00> : vector<128x128xf32>
    %13 = tpu.matmul %11, %12, %cst_9 {dimension_numbers = #tpu.dot_dimension_numbers<[1], [0], [0], [1], [0, 0, 1, 1], [], []>} : vector<128x128xbf16>, vector<128x128xbf16>, vector<128x128xf32> -> vector<128x128xf32>
    %c0_10 = arith.constant 0 : index
    %c0_11 = arith.constant 0 : index
    %14 = vector.load %arg6[%c0_10, %c0_11] : memref<16x512xbf16, #tpu.memory_space<vmem>>, vector<16x128xbf16>
    %cst_12 = arith.constant dense<0.000000e+00> : vector<128x128xf32>
    %15 = tpu.matmul %10, %14, %cst_12 {dimension_numbers = #tpu.dot_dimension_numbers<[1], [0], [0], [1], [0, 0, 1, 1], [], []>} : vector<128x16xbf16>, vector<16x128xbf16>, vector<128x128xf32> -> vector<128x128xf32>
    %c0_13 = arith.constant 0 : index
    %c0_14 = arith.constant 0 : index
    %16 = vector.load %arg7[%c0_13, %c0_14] : memref<1x512xf32, #tpu.memory_space<vmem>>, vector<1x128xf32>
    %17 = vector.broadcast %16 : vector<1x128xf32> to vector<128x128xf32>
    %18 = arith.addf %15, %17 : vector<128x128xf32>
    %19 = vector.extract_strided_slice %13 {offsets = [0, 0], sizes = [128, 1], strides = [1, 1]} : vector<128x128xf32> to vector<128x1xf32>
    %20 = vector.broadcast %19 : vector<128x1xf32> to vector<128x128xf32>
    %21 = arith.mulf %20, %18 : vector<128x128xf32>
    %c0_15 = arith.constant 0 : index
    %c128 = arith.constant 128 : index
    %22 = vector.load %arg6[%c0_15, %c128] : memref<16x512xbf16, #tpu.memory_space<vmem>>, vector<16x128xbf16>
    %cst_16 = arith.constant dense<0.000000e+00> : vector<128x128xf32>
    %23 = tpu.matmul %10, %22, %cst_16 {dimension_numbers = #tpu.dot_dimension_numbers<[1], [0], [0], [1], [0, 0, 1, 1], [], []>} : vector<128x16xbf16>, vector<16x128xbf16>, vector<128x128xf32> -> vector<128x128xf32>
    %c0_17 = arith.constant 0 : index
    %c128_18 = arith.constant 128 : index
    %24 = vector.load %arg7[%c0_17, %c128_18] : memref<1x512xf32, #tpu.memory_space<vmem>>, vector<1x128xf32>
    %25 = vector.broadcast %24 : vector<1x128xf32> to vector<128x128xf32>
    %26 = arith.addf %23, %25 : vector<128x128xf32>
    %27 = vector.extract_strided_slice %13 {offsets = [0, 1], sizes = [128, 1], strides = [1, 1]} : vector<128x128xf32> to vector<128x1xf32>
    %28 = vector.broadcast %27 : vector<128x1xf32> to vector<128x128xf32>
    %29 = arith.mulf %28, %26 : vector<128x128xf32>
    %30 = arith.addf %21, %29 : vector<128x128xf32>
    %c0_19 = arith.constant 0 : index
    %c256 = arith.constant 256 : index
    %31 = vector.load %arg6[%c0_19, %c256] : memref<16x512xbf16, #tpu.memory_space<vmem>>, vector<16x128xbf16>
    %cst_20 = arith.constant dense<0.000000e+00> : vector<128x128xf32>
    %32 = tpu.matmul %10, %31, %cst_20 {dimension_numbers = #tpu.dot_dimension_numbers<[1], [0], [0], [1], [0, 0, 1, 1], [], []>} : vector<128x16xbf16>, vector<16x128xbf16>, vector<128x128xf32> -> vector<128x128xf32>
    %c0_21 = arith.constant 0 : index
    %c256_22 = arith.constant 256 : index
    %33 = vector.load %arg7[%c0_21, %c256_22] : memref<1x512xf32, #tpu.memory_space<vmem>>, vector<1x128xf32>
    %34 = vector.broadcast %33 : vector<1x128xf32> to vector<128x128xf32>
    %35 = arith.addf %32, %34 : vector<128x128xf32>
    %36 = vector.extract_strided_slice %13 {offsets = [0, 2], sizes = [128, 1], strides = [1, 1]} : vector<128x128xf32> to vector<128x1xf32>
    %37 = vector.broadcast %36 : vector<128x1xf32> to vector<128x128xf32>
    %38 = arith.mulf %37, %35 : vector<128x128xf32>
    %39 = arith.addf %30, %38 : vector<128x128xf32>
    %c0_23 = arith.constant 0 : index
    %c384 = arith.constant 384 : index
    %40 = vector.load %arg6[%c0_23, %c384] : memref<16x512xbf16, #tpu.memory_space<vmem>>, vector<16x128xbf16>
    %cst_24 = arith.constant dense<0.000000e+00> : vector<128x128xf32>
    %41 = tpu.matmul %10, %40, %cst_24 {dimension_numbers = #tpu.dot_dimension_numbers<[1], [0], [0], [1], [0, 0, 1, 1], [], []>} : vector<128x16xbf16>, vector<16x128xbf16>, vector<128x128xf32> -> vector<128x128xf32>
    %c0_25 = arith.constant 0 : index
    %c384_26 = arith.constant 384 : index
    %42 = vector.load %arg7[%c0_25, %c384_26] : memref<1x512xf32, #tpu.memory_space<vmem>>, vector<1x128xf32>
    %43 = vector.broadcast %42 : vector<1x128xf32> to vector<128x128xf32>
    %44 = arith.addf %41, %43 : vector<128x128xf32>
    %45 = vector.extract_strided_slice %13 {offsets = [0, 3], sizes = [128, 1], strides = [1, 1]} : vector<128x128xf32> to vector<128x1xf32>
    %46 = vector.broadcast %45 : vector<128x1xf32> to vector<128x128xf32>
    %47 = arith.mulf %46, %44 : vector<128x128xf32>
    %48 = arith.addf %39, %47 : vector<128x128xf32>
    %49 = arith.truncf %48 : vector<128x128xf32> to vector<128x128xbf16>
    %c0_27 = arith.constant 0 : index
    %c0_28 = arith.constant 0 : index
    %50 = vector.load %arg8[%c0_27, %c0_28] : memref<128x128xbf16, #tpu.memory_space<vmem>>, vector<128x128xbf16>
    tpu.vector_store %arg8[%c0_27, %c0_28], %49 {strides = array<i32>} : memref<128x128xbf16, #tpu.memory_space<vmem>>, vector<128x128xbf16>,
    return
  }
  func.func @transform_0(%arg0: i32) -> (i32, i32) {
    %c0_i32 = arith.constant 0 : i32
    %c0_i32_0 = arith.constant 0 : i32
    %c0_i32_1 = arith.constant 0 : i32
    return %c0_i32, %c0_i32_0 : i32, i32
  }
  func.func @transform_1(%arg0: i32) -> (i32, i32) {
    %c0_i32 = arith.constant 0 : i32
    %c0_i32_0 = arith.constant 0 : i32
    return %arg0, %c0_i32 : i32, i32
  }
  func.func @transform_2(%arg0: i32) -> (i32, i32) {
    %c0_i32 = arith.constant 0 : i32
    %c0_i32_0 = arith.constant 0 : i32
    return %arg0, %c0_i32 : i32, i32
  }
  func.func @transform_3(%arg0: i32) -> (i32, i32) {
    %c0_i32 = arith.constant 0 : i32
    %c0_i32_0 = arith.constant 0 : i32
    %c0_i32_1 = arith.constant 0 : i32
    return %c0_i32, %c0_i32_0 : i32, i32
  }
  func.func @transform_4(%arg0: i32) -> (i32, i32) {
    %c0_i32 = arith.constant 0 : i32
    %c0_i32_0 = arith.constant 0 : i32
    %c0_i32_1 = arith.constant 0 : i32
    return %c0_i32, %c0_i32_0 : i32, i32
  }
  func.func @transform_5(%arg0: i32) -> (i32, i32) {
    %c0_i32 = arith.constant 0 : i32
    %c0_i32_0 = arith.constant 0 : i32
    %c0_i32_1 = arith.constant 0 : i32
    return %c0_i32, %c0_i32_0 : i32, i32
  }
  func.func @transform_6(%arg0: i32) -> (i32, i32) {
    %c0_i32 = arith.constant 0 : i32
    %c0_i32_0 = arith.constant 0 : i32
    %c0_i32_1 = arith.constant 0 : i32
    return %c0_i32, %c0_i32_0 : i32, i32
  }
  func.func @transform_7(%arg0: i32) -> (i32, i32) {
    %c0_i32 = arith.constant 0 : i32
    %c0_i32_0 = arith.constant 0 : i32
    return %arg0, %c0_i32 : i32, i32
  }
}

</mosaic_0001>

<bundles_post_ra>
// kernel: tpu_custom_call.1
= control target key start
LH: loop header
LB: loop body
LE: loop exit
PB: predicated region body
PF: predicated region fallthrough
CT: control target
= control target key end

     0   :  { %12 = vsyncpa [#allocation3], 0  ;;  %s2047_s0 = inlined_call_operand.vmem [shape: bf16[128,128], index: 0, kind: input, shape index: {}]   ;;  %s2048_s1 = inlined_call_operand.vmem [shape: f32[128,1], index: 1, kind: input, shape index: {}]   ;;  %s2049_s2 = inlined_call_operand.vmem [shape: bf16[128,128], index: 2, kind: input, shape index: {}]   ;;  %s2050_s3 = inlined_call_operand.hbm [shape: f32[1,16], index: 3, kind: input, shape index: {}]   ;;  %s2051_s4 = inlined_call_operand.hbm [shape: f32[1,16], index: 4, kind: input, shape index: {}]   ;;  %s2052_s5 = inlined_call_operand.hbm [shape: bf16[16,512], index: 5, kind: input, shape index: {}]   ;;  %s2053_s6 = inlined_call_operand.vmem [shape: f32[1,512], index: 6, kind: input, shape index: {}]   ;;  %s2054_s7 = inlined_call_operand.hbm [shape: bf16[128,128], index: 7, kind: output, shape index: {}]  }
   0x1   :  { %13 = vsyncpa [#allocation6], 0  ;;  %s37_s26 = sshll.u32 %s2051_s4, 4  ;;  %s38_s26 = int_to_ptr.hbm [resolvable:$true] %s37_s26 }
   0x2   :  { %14 = vsyncpa [#allocation4], 0  ;;  %s1480_s27 = smov [#allocation5]   ;;  %s26_s8 = sshll.u32 %s2050_s3, 4  ;;  %s27_s8 = int_to_ptr.hbm [resolvable:$true] %s26_s8 }
   0x3   :  { %s39_s28 = sshll.u32 %s1480_s27, 4  ;;  %s1481_s9 = smov [#allocation2]   ;;  %s40_s28 = int_to_ptr.vmem [resolvable:$true] %s39_s28 }
   0x4   :  { %42 = dma.hbm_to_vmem [thread:$0]  %s38_s26, 16, %s40_s28, [#allocation6]  }
   0x5   :  { %s28_s10 = sshll.u32 %s1481_s9, 4  ;;  %s47_s13 = sshll.u32 %s2052_s5, 4  ;;  %s29_s10 = int_to_ptr.vmem [resolvable:$true] %s28_s10  ;;  %s48_s13 = int_to_ptr.hbm [resolvable:$true] %s47_s13 }
   0x6   :  { %31 = dma.hbm_to_vmem [thread:$0]  %s27_s8, 16, %s29_s10, [#allocation3]  }
   0x7   :  { %s1482_s4 = smov [#allocation7]   ;;  %s1483_s15 = smov 256  }
   0x8   :  { %s49_s14 = sshll.u32 %s1482_s4, 4  ;;  %s1484_s16 = smov 16   ;;  %s50_s14 = int_to_ptr.vmem [resolvable:$true] %s49_s14 }
   0x9   :  { %55 = dma.hbm_to_vmem [thread:$0]  %s48_s13, 512, %s50_s14, [#allocation6], %s1483_s15, %s1483_s15, %s1484_s16  }
   0xa   :  { %1474 = dma.done.wait [#allocation3], 16  }
   0xb   :  { %1475 = vsyncadd [#allocation3], 4294967280 }
   0xc   :  { %1476 = dma.done.wait [#allocation6], 528  }
   0xd   :  { %1477 = vsyncadd [#allocation6], 4294966768  ;;  %v1485_v0 = vmov 0   ;;  %v73_v1 = vld [vmem:[%s2048_s1 + $0x10] sm:$0xff]  ;;  %v71_v2 = vld [vmem:[%s2048_s1] sm:$0xff]  ;;  %v1486_v47 = vmov 1  }
   0xe   :  { %1307 = vset.pattern.permute.xlu1 %v1485_v0  ;;  %1306 = vset.pattern.permute.xlu0 %v1485_v0  ;;  %v1240_v3 = vld [vmem:[%s2047_s0 + $0x38] sm:$0xff]  ;;  %v1239_v4 = vld [vmem:[%s2047_s0 + $0x30] sm:$0xff]  ;;  %v75_v5 = vld [vmem:[%s2048_s1 + $0x20] sm:$0xff]  ;;  %v1487_v48 = vmov 3   ;;  %vm420_vm0 = vcmask 130048   ;;  %s1490_s12 = smov 64  }
   0xf   :  { %1308 = vset.pattern.permute.xlu2 %v1485_v0  ;;  %100 = vperm.xlu1 %1307, %v73_v1   ;;  %v74_v6 = vld [vmem:[%s2048_s1 + $0x18] sm:$0xff]  ;;  %v72_v7 = vld [vmem:[%s2048_s1 + $0x8] sm:$0xff]  ;;  %v1237_v9 = vld [vmem:[%s2047_s0 + $0x20] sm:$0xff]  ;;  %s1491_s13 = smov 4  }
  0x10   :  { %90 = vperm.xlu0 %1306, %v71_v2   ;;  %359 = vmatpush.bf16.msra.mxu0 %v1240_v3  ;;  %v1238_v8 = vld [vmem:[%s2047_s0 + $0x28] sm:$0xff]  ;;  %v78_v11 = vld [vmem:[%s2048_s1 + $0x38] sm:$0xff]  ;;  %v77_v12 = vld [vmem:[%s2048_s1 + $0x30] sm:$0xff] }
  0x11   :  { %110 = vperm.xlu2 %1308, %v75_v5   ;;  %v76_v10 = vld [vmem:[%s2048_s1 + $0x28] sm:$0xff]  ;;  %v1236_v13 = vld [vmem:[%s2047_s0 + $0x18] sm:$0xff]  ;;  %v1235_v14 = vld [vmem:[%s2047_s0 + $0x10] sm:$0xff] }
  0x12   :  { %v79_v15 = vld [vmem:[%s2048_s1 + $0x40] sm:$0xff]  ;;  %v81_v16 = vld [vmem:[%s2048_s1 + $0x50] sm:$0xff]  ;;  %v80_v17 = vld [vmem:[%s2048_s1 + $0x48] sm:$0xff] }
  0x13   :  { %v1234_v18 = vld [vmem:[%s2047_s0 + $0x8] sm:$0xff]  ;;  %v1233_v19 = vld [vmem:[%s2047_s0] sm:$0xff]  ;;  %v82_v20 = vld [vmem:[%s2048_s1 + $0x58] sm:$0xff]  ;;  %s1099_s0 = sshll.u32 %s2054_s7, 4  ;;  %s1100_s0 = int_to_ptr.hbm [resolvable:$true] %s1099_s0 }
  0x14   :  { %360 = vmatpush.bf16.msra.mxu0 %v1239_v4  ;;  %v84_v21 = vld [vmem:[%s2048_s1 + $0x68] sm:$0xff]  ;;  %v83_v22 = vld [vmem:[%s2048_s1 + $0x60] sm:$0xff]  ;;  %v85_v24 = vld [vmem:[%s2048_s1 + $0x70] sm:$0xff] }
  0x15   :  { %v1225_v23 = vld [vmem:[%s2049_s2] sm:$0xff]  ;;  %v86_v25 = vld [vmem:[%s2048_s1 + $0x78] sm:$0xff]  ;;  %v1226_v26 = vld [vmem:[%s2049_s2 + $0x8] sm:$0xff] }
  0x16   :  { %v1227_v27 = vld [vmem:[%s2049_s2 + $0x10] sm:$0xff]  ;;  %v1228_v28 = vld [vmem:[%s2049_s2 + $0x18] sm:$0xff]  ;;  %v1229_v29 = vld [vmem:[%s2049_s2 + $0x20] sm:$0xff] }
  0x17   :  { %105 = vperm.xlu1 %1307, %v74_v6   ;;  %v1179_v30 = vld [vmem:[#allocation7] sm:$0xf]  ;;  %v1241_v31 = vld [vmem:[#allocation7 + $0xc] sm:$0xf0]  ;;  %v1230_v33 = vld [vmem:[%s2049_s2 + $0x28] sm:$0xff] }
  0x18   :  { %95 = vperm.xlu0 %1306, %v72_v7   ;;  %361 = vmatpush.bf16.msra.mxu0 %v1238_v8  ;;  %v1180_v32 = vor.u32 %v1241_v31, %v1179_v30  ;;  %v1634_v34 = vld [vmem:[#allocation2] ss:$0 sm:$0xff]  ;;  %v1636_v38 = vld [vmem:[#allocation5] ss:$0 sm:$0xff]  ;;  %v1231_v51 = vld [vmem:[%s2049_s2 + $0x30] sm:$0xff] }
  0x19   :  { %115 = vperm.xlu2 %1308, %v76_v10   ;;  %v1191_v61 = vld [vmem:[#allocation7 + $0x4] sm:$0xf]  ;;  %v1242_v62 = vld [vmem:[#allocation7 + $0x10] sm:$0xf0]  ;;  %v1203_v31 = vld [vmem:[#allocation7 + $0x8] sm:$0xf] }
  0x1a   :  { %452 = vmatpush.bf16.msra.mxu1 %v1180_v32  ;;  %1292 = vmatpush.bf16.msra.mxu2 %v1180_v32  ;;  %v1192_v4 = vor.u32 %v1242_v62, %v1191_v61  ;;  %v1488_v62 = vmov 2  }
  0x1b   :  { %1293 = vmatpush.bf16.msra.mxu3 %v1180_v32  ;;  %v1243_v32 = vld [vmem:[#allocation7 + $0x14] sm:$0xf0] }
  0x1c   :  { %362 = vmatpush.bf16.msra.mxu0 %v1237_v9 }
  0x1e   :  { %609 = vmatpush.bf16.msrb.mxu2 %v1192_v4 }
  0x1f   :  { %125 = vperm.xlu1 %1307, %v78_v11  }
  0x20   :  { %120 = vperm.xlu0 %1306, %v77_v12   ;;  %363 = vmatpush.bf16.msra.mxu0 %v1236_v13  ;;  %v1215_v12 = vld [vmem:[#allocation7 + $0xc] sm:$0xf]  ;;  %v1244_v13 = vld [vmem:[#allocation7 + $0x18] sm:$0xf0] }
  0x21   :  { %130 = vperm.xlu2 %1308, %v79_v15   ;;  %v1216_v15 = vor.u32 %v1244_v13, %v1215_v12 }
  0x23   :  { %923 = vmatpush.bf16.msrb.mxu1 %v1216_v15 }
  0x24   :  { %364 = vmatpush.bf16.msra.mxu0 %v1235_v14 }
  0x27   :  { %140 = vperm.xlu1 %1307, %v81_v16  }
  0x28   :  { %135 = vperm.xlu0 %1306, %v80_v17   ;;  %365 = vmatpush.bf16.msra.mxu0 %v1234_v18 }
  0x29   :  { %145 = vperm.xlu2 %1308, %v82_v20  }
  0x2c   :  { %366 = vmatpush.bf16.msra.mxu0 %v1233_v19 }
  0x2f   :  { %155 = vperm.xlu1 %1307, %v84_v21   ;;  %367 = vmatmul.bf16.vlgmr.msra.gmra.mxu0 %v1225_v23 }
  0x30   :  { %150 = vperm.xlu0 %1306, %v83_v22  }
  0x31   :  { %160 = vperm.xlu2 %1308, %v85_v24  }
  0x38   :  { %165 = vperm.xlu0 %1306, %v86_v25   ;;  %v1232_v25 = vld [vmem:[%s2049_s2 + $0x38] sm:$0xff] }
  0x39   :  { %1309 = vset.pattern.permute.xlu2 %v1486_v47 }
  0x3f   :  { %372 = vmatmul.bf16.gmra.mxu0 %v1226_v26 }
  0x40   :  { %1311 = vset.pattern.permute.xlu0 %v1487_v48 }
  0x4f   :  { %377 = vmatmul.bf16.gmra.mxu0 %v1227_v27 }
  0x5f   :  { %382 = vmatmul.bf16.gmra.mxu0 %v1228_v28 }
  0x6b   :  { %v111_v37 = vpop.permute.xlu2 %110 }
  0x6c   :  { %v175_v19 = vmul.f32 %v1634_v34, %v111_v37  ;;  %v1204_v37 = vor.u32 %v1243_v32, %v1203_v31 }
  0x6e   :  { %v195_v30 = vadd.f32 %v1636_v38, %v175_v19  ;;  %766 = vmatpush.bf16.msrb.mxu3 %v1204_v37 }
  0x6f   :  { %387 = vmatmul.bf16.gmra.mxu0 %v1229_v29 }
  0x73   :  { %v116_v46 = vpop.permute.xlu2 %115 }
  0x74   :  { %v176_v22 = vmul.f32 %v1634_v34, %v116_v46 }
  0x7b   :  { %v131_v3 = vpop.permute.xlu2 %130 }
  0x7c   :  { %v179_v10 = vmul.f32 %v1634_v34, %v131_v3 }
  0x7e   :  { %v199_v16 = vadd.f32 %v1636_v38, %v179_v10 }
  0x7f   :  { %392 = vmatmul.bf16.gmra.mxu0 %v1230_v33  ;;  %v196_v33 = vadd.f32 %v1636_v38, %v176_v22 }
  0x80   :  { %v215_v26 = vmax.f32 %v199_v16, 0.0 }
  0x81   :  { %v101_v35 = vpop.permute.xlu1 %100 }
  0x82   :  { %v91_v36 = vpop.permute.xlu0 %90  ;;  %v173_v52 = vmul.f32 %v1634_v34, %v101_v35 }
  0x83   :  { %v171_v39 = vmul.f32 %v1634_v34, %v91_v36  ;;  %v146_v18 = vpop.permute.xlu2 %145 }
  0x84   :  { %v193_v60 = vadd.f32 %v1636_v38, %v173_v52  ;;  %v182_v46 = vmul.f32 %v1634_v34, %v146_v18 }
  0x85   :  { %v191_v40 = vadd.f32 %v1636_v38, %v171_v39 }
  0x86   :  { %v209_v8 = vmax.f32 %v193_v60, 0.0 }
  0x87   :  { %v207_v44 = vmax.f32 %v191_v40, 0.0 }
  0x89   :  { %v106_v41 = vpop.permute.xlu1 %105 }
  0x8a   :  { %v96_v42 = vpop.permute.xlu0 %95  ;;  %v174_v55 = vmul.f32 %v1634_v34, %v106_v41 }
  0x8b   :  { %v172_v43 = vmul.f32 %v1634_v34, %v96_v42  ;;  %v161_v41 = vpop.permute.xlu2 %160 }
  0x8c   :  { %v194_v63 = vadd.f32 %v1636_v38, %v174_v55  ;;  %v202_v55 = vadd.f32 %v1636_v38, %v182_v46 }
  0x8d   :  { %v192_v45 = vadd.f32 %v1636_v38, %v172_v43  ;;  %v211_v43 = vmax.f32 %v195_v30, 0.0 }
  0x8e   :  { %v210_v9 = vmax.f32 %v194_v63, 0.0 }
  0x8f   :  { %v208_v49 = vmax.f32 %v192_v45, 0.0  ;;  %397 = vmatmul.bf16.gmra.mxu0 %v1231_v51 }
  0x90   :  { %v1665_v14 = vpack.c.bf16 %v210_v9, %v209_v8 }
  0x91   :  { %v1644_v50 = vpack.c.bf16 %v208_v49, %v207_v44  ;;  %v126_v53 = vpop.permute.xlu1 %125  ;;  %v212_v44 = vmax.f32 %v196_v33, 0.0  ;;  %v185_v49 = vmul.f32 %v1634_v34, %v161_v41 }
  0x92   :  { %v121_v54 = vpop.permute.xlu0 %120  ;;  %v178_v56 = vmul.f32 %v1634_v34, %v126_v53 }
  0x93   :  { %v177_v57 = vmul.f32 %v1634_v34, %v121_v54  ;;  %1181 = vmatmul.msk.bf16.vlgmr.msra.gmra.mxu1 %vm420_vm0, %v1644_v50  ;;  %v1694_v53 = vpack.c.bf16 %v212_v44, %v211_v43 }
  0x94   :  { %v198_v58 = vadd.f32 %v1636_v38, %v178_v56  ;;  %v205_v56 = vadd.f32 %v1636_v38, %v185_v49 }
  0x95   :  { %v197_v59 = vadd.f32 %v1636_v38, %v177_v57 }
  0x96   :  { %v214_v1 = vmax.f32 %v198_v58, 0.0 }
  0x97   :  { %v213_v2 = vmax.f32 %v197_v59, 0.0  ;;  %v218_v59 = vmax.f32 %v202_v55, 0.0 }
  0x99   :  { %v1659_v5 = vpack.c.bf16 %v214_v1, %v213_v2  ;;  %v141_v6 = vpop.permute.xlu1 %140 }
  0x9a   :  { %v136_v7 = vpop.permute.xlu0 %135  ;;  %v181_v45 = vmul.f32 %v1634_v34, %v141_v6 }
  0x9b   :  { %1184 = vmatmul.msk.bf16.vlgmr.msra.gmra.mxu2 %vm420_vm0, %v1659_v5  ;;  %v180_v11 = vmul.f32 %v1634_v34, %v136_v7 }
  0x9c   :  { %v201_v54 = vadd.f32 %v1636_v38, %v181_v45 }
  0x9d   :  { %v200_v17 = vadd.f32 %v1636_v38, %v180_v11 }
  0x9e   :  { %v217_v58 = vmax.f32 %v201_v54, 0.0 }
  0x9f   :  { %v216_v27 = vmax.f32 %v200_v17, 0.0  ;;  %402 = vmatmul.bf16.gmra.mxu0 %v1232_v25 }
  0xa0   :  { %v1705_v63 = vpack.c.bf16 %v218_v59, %v217_v58 }
  0xa1   :  { %v156_v20 = vpop.permute.xlu1 %155  ;;  %v1682_v39 = vpack.c.bf16 %v216_v27, %v215_v26 }
  0xa2   :  { %v151_v21 = vpop.permute.xlu0 %150  ;;  %v184_v23 = vmul.f32 %v1634_v34, %v156_v20 }
  0xa3   :  { %v183_v24 = vmul.f32 %v1634_v34, %v151_v21  ;;  %1182 = vmatmul.msk.bf16.gmra.mxu1 %vm420_vm0, %v1665_v14 }
  0xa4   :  { %v204_v28 = vadd.f32 %v1636_v38, %v184_v23  ;;  %v1820_v23 = vld [vmem:[%s2053_s6] ss:$0 sm:$0xff] }
  0xa5   :  { %v203_v29 = vadd.f32 %v1636_v38, %v183_v24 }
  0xa6   :  { %v220_v35 = vmax.f32 %v204_v28, 0.0 }
  0xa7   :  { %v219_v36 = vmax.f32 %v203_v29, 0.0 }
  0xa9   :  { %v1684_v40 = vpack.c.bf16 %v220_v35, %v219_v36 }
  0xaa   :  { %v166_v42 = vpop.permute.xlu0 %165 }
  0xab   :  { %1185 = vmatmul.msk.bf16.gmra.mxu2 %vm420_vm0, %v1682_v39  ;;  %1187 = vmatmul.msk.bf16.vlgmr.msra.gmra.mxu3 %vm420_vm0, %v1684_v40  ;;  %v186_v51 = vmul.f32 %v1634_v34, %v166_v42  ;;  %v221_v34 = vmax.f32 %v205_v56, 0.0 }
  0xac   :  { %v368_v52 = vpop.f32.mrf.mxu0 }
  0xad   :  { %652 = vperm.xlu2 %1309, %v368_v52   ;;  %496 = vperm.xlu1 %1307, %v368_v52   ;;  %v206_v57 = vadd.f32 %v1636_v38, %v186_v51 }
  0xae   :  { %966 = vperm.xlu0 %1311, %v368_v52  }
  0xaf   :  { %v222_v60 = vmax.f32 %v206_v57, 0.0 }
  0xb1   :  { %v1707_v1 = vpack.c.bf16 %v222_v60, %v221_v34 }
  0xb3   :  { %1183 = vmatmul.msk.bf16.gmra.mxu1 %vm420_vm0, %v1694_v53 }
  0xb4   :  { %v370_v61 = vpop.f32.mrf.mxu0 }
  0xb5   :  { %1312 = vset.pattern.permute.xlu2 %v1485_v0  ;;  %1310 = vset.pattern.permute.xlu1 %v1488_v62 }
  0xb6   :  { %1313 = vset.pattern.permute.xlu0 %v1486_v47  ;;  %501 = vperm.xlu2 %1312, %v370_v61  }
  0xb7   :  { %809 = vperm.xlu1 %1310, %v368_v52   ;;  %656 = vperm.xlu0 %1313, %v370_v61  }
  0xbb   :  { %1186 = vmatmul.msk.bf16.gmra.mxu2 %vm420_vm0, %v1705_v63  ;;  %1188 = vmatmul.msk.bf16.gmra.mxu3 %vm420_vm0, %v1707_v1 }
  0xbc   :  { %v373_v38 = vpop.f32.mrf.mxu0 }
  0xbe   :  { %1314 = vset.pattern.permute.xlu2 %v1488_v62 }
  0xbf   :  { %1315 = vset.pattern.permute.xlu1 %v1487_v48  ;;  %1316 = vset.pattern.permute.xlu0 %v1485_v0 }
  0xc0   :  { %813 = vperm.xlu2 %1314, %v370_v61   ;;  %970 = vperm.xlu1 %1315, %v370_v61   ;;  %v1905_v61 = vld [vmem:[%s2053_s6 + $0x1] ss:$0 sm:$0xff] }
  0xc1   :  { %506 = vperm.xlu0 %1316, %v373_v38  }
  0xc3   :  { %1217 = vmatmul.msk.bf16.vlgmr.msrb.gmra.mxu1 %vm420_vm0, %v1644_v50 }
  0xc4   :  { %v375_v2 = vpop.f32.mrf.mxu0 }
  0xc8   :  { %1319 = vset.pattern.permute.xlu2 %v1487_v48  ;;  %1317 = vset.pattern.permute.xlu1 %v1486_v47 }
  0xc9   :  { %1318 = vset.pattern.permute.xlu0 %v1488_v62  ;;  %974 = vperm.xlu2 %1319, %v373_v38  }
  0xca   :  { %660 = vperm.xlu1 %1317, %v373_v38   ;;  %817 = vperm.xlu0 %1318, %v373_v38  }
  0xcb   :  { %1193 = vmatmul.msk.bf16.vlgmr.msrb.gmra.mxu2 %vm420_vm0, %v1644_v50  ;;  %1205 = vmatmul.msk.bf16.vlgmr.msrb.gmra.mxu3 %vm420_vm0, %v1644_v50 }
  0xcc   :  { %v378_v3 = vpop.f32.mrf.mxu0 }
  0xd1   :  { %1321 = vset.pattern.permute.xlu2 %v1486_v47 }
  0xd2   :  { %1320 = vset.pattern.permute.xlu1 %v1485_v0  ;;  %664 = vperm.xlu2 %1321, %v375_v2  }
  0xd3   :  { %1218 = vmatmul.msk.bf16.gmra.mxu1 %vm420_vm0, %v1665_v14  ;;  %511 = vperm.xlu1 %1320, %v375_v2  }
  0xd4   :  { %1328 = vset.pattern.permute.xlu0 %v1485_v0  ;;  %v380_v4 = vpop.f32.mrf.mxu0 }
  0xd5   :  { %521 = vperm.xlu0 %1328, %v380_v4  }
  0xda   :  { %1324 = vset.pattern.permute.xlu2 %v1485_v0 }
  0xdb   :  { %1322 = vset.pattern.permute.xlu1 %v1488_v62  ;;  %1194 = vmatmul.msk.bf16.gmra.mxu2 %vm420_vm0, %v1665_v14 }
  0xdc   :  { %1206 = vmatmul.msk.bf16.gmra.mxu3 %vm420_vm0, %v1665_v14  ;;  %516 = vperm.xlu2 %1324, %v378_v3   ;;  %v383_v50 = vpop.f32.mrf.mxu0 }
  0xdd   :  { %821 = vperm.xlu1 %1322, %v375_v2   ;;  %1331 = vset.pattern.permute.xlu0 %v1487_v48 }
  0xde   :  { %986 = vperm.xlu0 %1331, %v380_v4  }
  0xe3   :  { %1219 = vmatmul.msk.bf16.gmra.mxu1 %vm420_vm0, %v1694_v53 }
  0xe4   :  { %1326 = vset.pattern.permute.xlu2 %v1488_v62  ;;  %v385_v6 = vpop.f32.mrf.mxu0 }
  0xe5   :  { %1323 = vset.pattern.permute.xlu1 %v1487_v48  ;;  %825 = vperm.xlu2 %1326, %v378_v3  }
  0xe6   :  { %978 = vperm.xlu1 %1323, %v375_v2   ;;  %1333 = vset.pattern.permute.xlu0 %v1486_v47 }
  0xe7   :  { %676 = vperm.xlu0 %1333, %v383_v50  }
  0xeb   :  { %1195 = vmatmul.msk.bf16.gmra.mxu2 %vm420_vm0, %v1694_v53 }
  0xec   :  { %1207 = vmatmul.msk.bf16.gmra.mxu3 %vm420_vm0, %v1694_v53  ;;  %v388_v7 = vpop.f32.mrf.mxu0 }
  0xed   :  { %1327 = vset.pattern.permute.xlu2 %v1487_v48 }
  0xee   :  { %1325 = vset.pattern.permute.xlu1 %v1486_v47  ;;  %982 = vperm.xlu2 %1327, %v378_v3  }
  0xef   :  { %668 = vperm.xlu1 %1325, %v378_v3   ;;  %1338 = vset.pattern.permute.xlu0 %v1488_v62 }
  0xf0   :  { %837 = vperm.xlu0 %1338, %v385_v6  }
  0xf3   :  { %1220 = vmatmul.msk.bf16.gmra.mxu1 %vm420_vm0, %v1659_v5 }
  0xf4   :  { %v390_v9 = vpop.f32.mrf.mxu0 }
  0xf6   :  { %1329 = vset.pattern.permute.xlu2 %v1486_v47 }
  0xf7   :  { %1330 = vset.pattern.permute.xlu1 %v1488_v62  ;;  %672 = vperm.xlu2 %1329, %v380_v4  }
  0xf8   :  { %829 = vperm.xlu1 %1330, %v380_v4   ;;  %1340 = vset.pattern.permute.xlu0 %v1485_v0  ;;  %v1915_v4 = vld [vmem:[%s2053_s6 + $0x2] ss:$0 sm:$0xff] }
  0xf9   :  { %536 = vperm.xlu0 %1340, %v388_v7  }
  0xfb   :  { %1196 = vmatmul.msk.bf16.gmra.mxu2 %vm420_vm0, %v1659_v5 }
  0xfc   :  { %1208 = vmatmul.msk.bf16.gmra.mxu3 %vm420_vm0, %v1659_v5  ;;  %v393_v11 = vpop.f32.mrf.mxu0 }
  0xff   :  { %1334 = vset.pattern.permute.xlu2 %v1488_v62 }
 0x100   :  { %1332 = vset.pattern.permute.xlu1 %v1485_v0  ;;  %833 = vperm.xlu2 %1334, %v383_v50  }
 0x101   :  { %526 = vperm.xlu1 %1332, %v383_v50   ;;  %1343 = vset.pattern.permute.xlu0 %v1487_v48 }
 0x102   :  { %998 = vperm.xlu0 %1343, %v388_v7  }
 0x103   :  { %1221 = vmatmul.msk.bf16.gmra.mxu1 %vm420_vm0, %v1682_v39 }
 0x104   :  { %v1787_v14 = vpop.f32.mrf.mxu0 }
 0x107   :  { %v1763_v8 = vpop.permute.xlu2 %652 }
 0x108   :  { %1336 = vset.pattern.permute.xlu2 %v1485_v0 }
 0x109   :  { %1335 = vset.pattern.permute.xlu1 %v1487_v48  ;;  %531 = vperm.xlu2 %1336, %v385_v6  }
 0x10a   :  { %990 = vperm.xlu1 %1335, %v383_v50   ;;  %1345 = vset.pattern.permute.xlu0 %v1486_v47 }
 0x10b   :  { %1197 = vmatmul.msk.bf16.gmra.mxu2 %vm420_vm0, %v1682_v39  ;;  %688 = vperm.xlu0 %1345, %v390_v9  }
 0x10c   :  { %1209 = vmatmul.msk.bf16.gmra.mxu3 %vm420_vm0, %v1682_v39  ;;  %v1815_v22 = vpop.f32.mrf.mxu0 }
 0x110   :  { %v1772_v5 = vpop.f32.mrf.mxu1  ;;  %v1774_v10 = vpop.permute.xlu2 %501 }
 0x111   :  { %1339 = vset.pattern.permute.xlu2 %v1487_v48  ;;  %v455_v3 = vadd.f32 %v1820_v23, %v1772_v5 }
 0x112   :  { %1337 = vset.pattern.permute.xlu1 %v1486_v47  ;;  %994 = vperm.xlu2 %1339, %v385_v6  }
 0x113   :  { %680 = vperm.xlu1 %1337, %v385_v6   ;;  %1222 = vmatmul.msk.bf16.gmra.mxu1 %vm420_vm0, %v1705_v63 }
 0x114   :  { %1350 = vset.pattern.permute.xlu0 %v1488_v62  ;;  %v1844_v32 = vpop.f32.mrf.mxu0 }
 0x115   :  { %849 = vperm.xlu0 %1350, %v393_v11  }
 0x118   :  { %v1781_v12 = vpop.f32.mrf.mxu1 }
 0x11a   :  { %1341 = vset.pattern.permute.xlu2 %v1486_v47  ;;  %v1784_v13 = vpop.permute.xlu2 %813 }
 0x11b   :  { %1342 = vset.pattern.permute.xlu1 %v1488_v62  ;;  %684 = vperm.xlu2 %1341, %v388_v7  }
 0x11c   :  { %841 = vperm.xlu1 %1342, %v388_v7   ;;  %1198 = vmatmul.msk.bf16.gmra.mxu2 %vm420_vm0, %v1705_v63  ;;  %v1874_v46 = vpop.f32.mrf.mxu0  ;;  %v457_v7 = vadd.f32 %v1820_v23, %v1781_v12 }
 0x11d   :  { %1210 = vmatmul.msk.bf16.gmra.mxu3 %vm420_vm0, %v1705_v63  ;;  %1352 = vset.pattern.permute.xlu0 %v1485_v0 }
 0x11e   :  { %v1791_v15 = vpop.f32.mrf.mxu2  ;;  %551 = vperm.xlu0 %1352, %v1787_v14  }
 0x11f   :  { %v1799_v17 = vpop.permute.xlu1 %496 }
 0x120   :  { %v1797_v16 = vpop.f32.mrf.mxu1  ;;  %v1856_v39 = vpop.permute.xlu0 %966  ;;  %v574_v5 = vmul.f32 %v1799_v17, %v455_v3 }
 0x123   :  { %1346 = vset.pattern.permute.xlu2 %v1488_v62  ;;  %1223 = vmatmul.msk.bf16.gmra.mxu1 %vm420_vm0, %v1684_v40  ;;  %v1804_v18 = vpop.permute.xlu2 %974 }
 0x124   :  { %1344 = vset.pattern.permute.xlu1 %v1485_v0  ;;  %845 = vperm.xlu2 %1346, %v390_v9   ;;  %v1896_v59 = vpop.f32.mrf.mxu0 }
 0x125   :  { %541 = vperm.xlu1 %1344, %v390_v9  }
 0x126   :  { %v1807_v19 = vpop.f32.mrf.mxu2  ;;  %1355 = vset.pattern.permute.xlu0 %v1487_v48 }
 0x127   :  { %1010 = vperm.xlu0 %1355, %v1787_v14  }
 0x128   :  { %v1810_v20 = vpop.f32.mrf.mxu1 }
 0x129   :  { %v1813_v21 = vpop.permute.xlu1 %809  ;;  %v657_v52 = vpop.permute.xlu0 %656 }
 0x12c   :  { %1199 = vmatmul.msk.bf16.gmra.mxu2 %vm420_vm0, %v1684_v40  ;;  %1348 = vset.pattern.permute.xlu2 %v1485_v0  ;;  %v1828_v25 = vpop.permute.xlu2 %664 }
 0x12d   :  { %1211 = vmatmul.msk.bf16.gmra.mxu3 %vm420_vm0, %v1684_v40  ;;  %1347 = vset.pattern.permute.xlu1 %v1487_v48 }
 0x12e   :  { %v474_v24 = vpop.f32.mrf.mxu2  ;;  %v484_v27 = vpop.f32.mrf.mxu3  ;;  %546 = vperm.xlu2 %1348, %v393_v11   ;;  %1002 = vperm.xlu1 %1347, %v390_v9  }
 0x12f   :  { %v1831_v26 = vadd.f32 %v1820_v23, %v474_v24  ;;  %v1834_v28 = vadd.f32 %v1820_v23, %v484_v27  ;;  %1357 = vset.pattern.permute.xlu0 %v1486_v47 }
 0x130   :  { %v1836_v29 = vpop.f32.mrf.mxu1  ;;  %700 = vperm.xlu0 %1357, %v1815_v22  }
 0x132   :  { %v1840_v30 = vpop.permute.xlu1 %970 }
 0x133   :  { %1224 = vmatmul.msk.bf16.gmra.mxu1 %vm420_vm0, %v1707_v1  ;;  %v507_v60 = vpop.permute.xlu0 %506 }
 0x136   :  { %v476_v31 = vpop.f32.mrf.mxu2  ;;  %v486_v35 = vpop.f32.mrf.mxu3  ;;  %1351 = vset.pattern.permute.xlu2 %v1487_v48  ;;  %1349 = vset.pattern.permute.xlu1 %v1486_v47 }
 0x137   :  { %v1847_v33 = vadd.f32 %v1820_v23, %v476_v31  ;;  %v1852_v36 = vadd.f32 %v1820_v23, %v486_v35  ;;  %1006 = vperm.xlu2 %1351, %v393_v11   ;;  %v1858_v40 = vpop.permute.xlu2 %516  ;;  %692 = vperm.xlu1 %1349, %v393_v11   ;;  %v575_v35 = vmul.f32 %v1774_v10, %v457_v7 }
 0x138   :  { %v1854_v37 = vpop.f32.mrf.mxu1  ;;  %1362 = vset.pattern.permute.xlu0 %v1488_v62 }
 0x139   :  { %861 = vperm.xlu0 %1362, %v1844_v32  }
 0x13c   :  { %1200 = vmatmul.msk.bf16.gmra.mxu2 %vm420_vm0, %v1707_v1  ;;  %v1864_v41 = vpop.permute.xlu1 %660  ;;  %v818_v11 = vpop.permute.xlu0 %817 }
 0x13d   :  { %1212 = vmatmul.msk.bf16.gmra.mxu3 %vm420_vm0, %v1707_v1 }
 0x13e   :  { %v479_v42 = vpop.f32.mrf.mxu2  ;;  %v489_v43 = vpop.f32.mrf.mxu3 }
 0x13f   :  { %v1869_v44 = vadd.f32 %v1820_v23, %v479_v42  ;;  %v1872_v45 = vadd.f32 %v1820_v23, %v489_v43  ;;  %1353 = vset.pattern.permute.xlu2 %v1486_v47  ;;  %1354 = vset.pattern.permute.xlu1 %v1488_v62  ;;  %v1878_v49 = vpop.permute.xlu2 %825 }
 0x140   :  { %696 = vperm.xlu2 %1353, %v1787_v14   ;;  %853 = vperm.xlu1 %1354, %v1787_v14   ;;  %v925_v51 = vpop.f32.mrf.mxu1  ;;  %v1932_v14 = vld [vmem:[%s2053_s6 + $0x3] ss:$0 sm:$0xff]  ;;  %s1489_s6 = smov [#allocation8]  }
 0x141   :  { %1363 = vset.pattern.permute.xlu0 %v1485_v0  ;;  %v926_v17 = vadd.f32 %v1932_v14, %v925_v51  ;;  %s1097_s9 = sshll.u32 %s1489_s6, 4  ;;  %s1098_s9 = int_to_ptr.vmem [resolvable:$true] %s1097_s9 }
 0x142   :  { %566 = vperm.xlu0 %1363, %v1874_v46  }
 0x143   :  { %v1029_v10 = vmul.f32 %v1856_v39, %v926_v17 }
 0x145   :  { %v1884_v53 = vpop.permute.xlu1 %511 }
 0x146   :  { %v481_v54 = vpop.f32.mrf.mxu2  ;;  %v491_v56 = vpop.f32.mrf.mxu3 }
 0x147   :  { %v1887_v55 = vadd.f32 %v1820_v23, %v481_v54  ;;  %v1890_v57 = vadd.f32 %v1820_v23, %v491_v56 }
 0x148   :  { %1358 = vset.pattern.permute.xlu2 %v1488_v62  ;;  %1356 = vset.pattern.permute.xlu1 %v1485_v0  ;;  %v1894_v58 = vpop.permute.xlu2 %982  ;;  %v927_v34 = vpop.f32.mrf.mxu1 }
 0x149   :  { %857 = vperm.xlu2 %1358, %v1815_v22   ;;  %556 = vperm.xlu1 %1356, %v1815_v22   ;;  %v928_v43 = vadd.f32 %v1932_v14, %v927_v34 }
 0x14a   :  { %1367 = vset.pattern.permute.xlu0 %v1486_v47 }
 0x14b   :  { %712 = vperm.xlu0 %1367, %v1896_v59   ;;  %v1030_v51 = vmul.f32 %v1840_v30, %v928_v43 }
 0x14e   :  { %v611_v63 = vpop.f32.mrf.mxu2  ;;  %v768_v1 = vpop.f32.mrf.mxu3 }
 0x14f   :  { %v1907_v38 = vpop.permute.xlu1 %821  ;;  %v612_v2 = vadd.f32 %v1905_v61, %v611_v63 }
 0x150   :  { %v930_v9 = vpop.f32.mrf.mxu1 }
 0x151   :  { %1360 = vset.pattern.permute.xlu2 %v1485_v0  ;;  %1359 = vset.pattern.permute.xlu1 %v1487_v48  ;;  %v1919_v50 = vpop.permute.xlu2 %672  ;;  %v715_v6 = vmul.f32 %v1763_v8, %v612_v2 }
 0x152   :  { %561 = vperm.xlu2 %1360, %v1844_v32   ;;  %1014 = vperm.xlu1 %1359, %v1815_v22   ;;  %v769_v22 = vadd.f32 %v1915_v4, %v768_v1 }
 0x153   :  { %1370 = vset.pattern.permute.xlu0 %v1487_v48  ;;  %v731_v27 = vadd.f32 %v715_v6, %v574_v5 }
 0x154   :  { %1022 = vperm.xlu0 %1370, %v1874_v46   ;;  %v872_v54 = vmul.f32 %v1813_v21, %v769_v22  ;;  %v1950_v21 = vpop.permute.xlu0 %521 }
 0x156   :  { %v613_v24 = vpop.f32.mrf.mxu2  ;;  %v770_v8 = vpop.f32.mrf.mxu3  ;;  %v888_v1 = vadd.f32 %v872_v54, %v731_v27 }
 0x157   :  { %v614_v31 = vadd.f32 %v1905_v61, %v613_v24  ;;  %v771_v12 = vadd.f32 %v1915_v4, %v770_v8  ;;  %v460_v8 = vadd.f32 %v1820_v23, %v1797_v16 }
 0x158   :  { %v979_v42 = vpop.permute.xlu1 %978  ;;  %v932_v34 = vpop.f32.mrf.mxu1 }
 0x159   :  { %v716_v56 = vmul.f32 %v657_v52, %v614_v31  ;;  %v873_v3 = vmul.f32 %v1784_v13, %v771_v12  ;;  %v576_v27 = vmul.f32 %v507_v60, %v460_v8  ;;  %v462_v12 = vadd.f32 %v1820_v23, %v1810_v20 }
 0x15a   :  { %1364 = vset.pattern.permute.xlu2 %v1486_v47  ;;  %1361 = vset.pattern.permute.xlu1 %v1486_v47  ;;  %v1943_v63 = vpop.permute.xlu2 %833  ;;  %v1045_v47 = vadd.f32 %v1029_v10, %v888_v1  ;;  %v931_v1 = vadd.f32 %v1932_v14, %v930_v9  ;;  %v467_v8 = vadd.f32 %v1820_v23, %v1854_v37 }
 0x15b   :  { %v732_v2 = vadd.f32 %v716_v56, %v575_v35  ;;  %708 = vperm.xlu2 %1364, %v1874_v46   ;;  %704 = vperm.xlu1 %1361, %v1844_v32  }
 0x15c   :  { %v987_v16 = vpop.permute.xlu0 %986 }
 0x15d   :  { %v889_v52 = vadd.f32 %v873_v3, %v732_v2 }
 0x15e   :  { %v616_v6 = vpop.f32.mrf.mxu2 }
 0x15f   :  { %v1046_v7 = vadd.f32 %v1030_v51, %v889_v52  ;;  %v617_v5 = vadd.f32 %v1905_v61, %v616_v6  ;;  %v773_v22 = vpop.f32.mrf.mxu3 }
 0x160   :  { %v774_v31 = vadd.f32 %v1915_v4, %v773_v22  ;;  %v935_v54 = vpop.f32.mrf.mxu1 }
 0x161   :  { %v1248_v24 = vpack.c.bf16 %v1046_v7, %v1045_v47  ;;  %v669_v13 = vpop.permute.xlu1 %668  ;;  %v717_v39 = vmul.f32 %v1864_v41, %v617_v5 }
 0x162   :  { %v874_v60 = vmul.f32 %v818_v11, %v774_v31 }
 0x163   :  { %1249 = vst [vmem:[#allocation8] sm:$0xff] %v1248_v24   ;;  %1368 = vset.pattern.permute.xlu2 %v1488_v62  ;;  %1365 = vset.pattern.permute.xlu1 %v1488_v62  ;;  %v1958_v30 = vpop.permute.xlu2 %531  ;;  %v733_v17 = vadd.f32 %v717_v39, %v576_v27  ;;  %v577_v62 = vmul.f32 %v1884_v53, %v462_v12 }
 0x164   :  { %869 = vperm.xlu2 %1368, %v1896_v59   ;;  %865 = vperm.xlu1 %1365, %v1874_v46   ;;  %v933_v46 = vadd.f32 %v1932_v14, %v932_v34  ;;  %v1031_v53 = vmul.f32 %v1804_v18, %v931_v1  ;;  %v677_v7 = vpop.permute.xlu0 %676 }
 0x165   :  { %v890_v20 = vadd.f32 %v874_v60, %v733_v17 }
 0x166   :  { %v618_v35 = vpop.f32.mrf.mxu2  ;;  %v1032_v52 = vmul.f32 %v979_v42, %v933_v46 }
 0x167   :  { %v619_v41 = vadd.f32 %v1905_v61, %v618_v35  ;;  %v775_v43 = vpop.f32.mrf.mxu3  ;;  %v1047_v11 = vadd.f32 %v1031_v53, %v890_v20  ;;  %v936_v35 = vadd.f32 %v1932_v14, %v935_v54 }
 0x168   :  { %v776_v56 = vadd.f32 %v1915_v4, %v775_v43  ;;  %v937_v18 = vpop.f32.mrf.mxu1 }
 0x169   :  { %v718_v2 = vmul.f32 %v1828_v25, %v619_v41  ;;  %v1033_v46 = vmul.f32 %v1894_v58, %v936_v35 }
 0x16a   :  { %v830_v3 = vpop.permute.xlu1 %829  ;;  %v875_v51 = vmul.f32 %v1907_v38, %v776_v56 }
 0x16b   :  { %v734_v10 = vadd.f32 %v718_v2, %v577_v62 }
 0x16c   :  { %1369 = vset.pattern.permute.xlu2 %v1487_v48  ;;  %1366 = vset.pattern.permute.xlu1 %v1485_v0  ;;  %v1976_v9 = vpop.permute.xlu2 %994  ;;  %v465_v0 = vadd.f32 %v1820_v23, %v1836_v29 }
 0x16d   :  { %v891_v6 = vadd.f32 %v875_v51, %v734_v10  ;;  %1018 = vperm.xlu2 %1369, %v1844_v32   ;;  %571 = vperm.xlu1 %1366, %v1896_v59  }
 0x16e   :  { %v621_v25 = vpop.f32.mrf.mxu2  ;;  %v578_v32 = vmul.f32 %v1858_v40, %v465_v0 }
 0x16f   :  { %v1048_v34 = vadd.f32 %v1032_v52, %v891_v6  ;;  %v622_v47 = vadd.f32 %v1905_v61, %v621_v25  ;;  %v778_v38 = vpop.f32.mrf.mxu3 }
 0x170   :  { %v779_v24 = vadd.f32 %v1915_v4, %v778_v38  ;;  %v940_v56 = vpop.f32.mrf.mxu1 }
 0x171   :  { %v1253_v5 = vpack.c.bf16 %v1048_v34, %v1047_v11  ;;  %v719_v42 = vmul.f32 %v669_v13, %v622_v47  ;;  %v579_v13 = vmul.f32 %v1950_v21, %v467_v8  ;;  %v472_v34 = vadd.f32 %v1820_v23, %v1807_v19 }
 0x172   :  { %v876_v17 = vmul.f32 %v1878_v49, %v779_v24 }
 0x173   :  { %1285 = vst [vmem:[#allocation8 + $0x8] sm:$0xff] %v1253_v5   ;;  %v527_v22 = vpop.permute.xlu1 %526  ;;  %v735_v27 = vadd.f32 %v719_v42, %v578_v32 }
 0x175   :  { %1371 = vset.pattern.permute.xlu1 %v1487_v48  ;;  %v1988_v31 = vpop.permute.xlu2 %684  ;;  %v938_v48 = vadd.f32 %v1932_v14, %v937_v18  ;;  %v892_v41 = vadd.f32 %v876_v17, %v735_v27 }
 0x176   :  { %1026 = vperm.xlu1 %1371, %v1896_v59   ;;  %v623_v39 = vpop.f32.mrf.mxu2  ;;  %v838_v59 = vpop.permute.xlu0 %837 }
 0x177   :  { %v624_v29 = vadd.f32 %v1905_v61, %v623_v39  ;;  %v780_v12 = vpop.f32.mrf.mxu3  ;;  %v1034_v60 = vmul.f32 %v987_v16, %v938_v48  ;;  %v1049_v20 = vadd.f32 %v1033_v46, %v892_v41 }
 0x178   :  { %v781_v40 = vadd.f32 %v1915_v4, %v780_v12  ;;  %v942_v16 = vpop.f32.mrf.mxu1 }
 0x179   :  { %v720_v37 = vmul.f32 %v1919_v50, %v624_v29  ;;  %v470_v50 = vadd.f32 %v1820_v23, %v1791_v15  ;;  %v581_v15 = vmul.f32 %v1958_v30, %v472_v34 }
 0x17a   :  { %v877_v62 = vmul.f32 %v830_v3, %v781_v40 }
 0x17b   :  { %v736_v43 = vadd.f32 %v720_v37, %v579_v13  ;;  %v580_v6 = vmul.f32 %v527_v22, %v470_v50  ;;  %v941_v22 = vadd.f32 %v1932_v14, %v940_v56 }
 0x17c   :  { %v991_v1 = vpop.permute.xlu1 %990 }
 0x17d   :  { %v893_v21 = vadd.f32 %v877_v62, %v736_v43  ;;  %v1035_v27 = vmul.f32 %v991_v1, %v941_v22 }
 0x17e   :  { %v626_v2 = vpop.f32.mrf.mxu2  ;;  %v846_v49 = vpop.permute.xlu2 %845 }
 0x17f   :  { %v1050_v10 = vadd.f32 %v1034_v60, %v893_v21  ;;  %v627_v54 = vadd.f32 %v1905_v61, %v626_v2  ;;  %v783_v51 = vpop.f32.mrf.mxu3  ;;  %v537_v3 = vpop.permute.xlu0 %536 }
 0x180   :  { %v784_v25 = vadd.f32 %v1915_v4, %v783_v51  ;;  %v945_v48 = vpop.f32.mrf.mxu1  ;;  %v582_v1 = vmul.f32 %v537_v3, %v1831_v26 }
 0x181   :  { %v1258_v53 = vpack.c.bf16 %v1050_v10, %v1049_v20  ;;  %v721_v52 = vmul.f32 %v677_v7, %v627_v54  ;;  %v943_v7 = vadd.f32 %v1932_v14, %v942_v16  ;;  %v946_v54 = vadd.f32 %v1932_v14, %v945_v48 }
 0x182   :  { %v878_v18 = vmul.f32 %v1943_v63, %v784_v25 }
 0x183   :  { %1286 = vst [vmem:[#allocation8 + $0x10] sm:$0xff] %v1258_v53   ;;  %v737_v47 = vadd.f32 %v721_v52, %v580_v6  ;;  %v1036_v23 = vmul.f32 %v1976_v9, %v943_v7 }
 0x185   :  { %v681_v58 = vpop.permute.xlu1 %680  ;;  %v894_v32 = vadd.f32 %v878_v18, %v737_v47 }
 0x186   :  { %v628_v11 = vpop.f32.mrf.mxu2 }
 0x187   :  { %v629_v38 = vadd.f32 %v1905_v61, %v628_v11  ;;  %v785_v0 = vpop.f32.mrf.mxu3  ;;  %v999_v19 = vpop.permute.xlu0 %998  ;;  %v1051_v40 = vadd.f32 %v1035_v27, %v894_v32 }
 0x188   :  { %v786_v5 = vadd.f32 %v1915_v4, %v785_v0  ;;  %v547_v39 = vpop.permute.xlu2 %546  ;;  %v947_v21 = vpop.f32.mrf.mxu1 }
 0x189   :  { %v722_v42 = vmul.f32 %v681_v58, %v629_v38  ;;  %v1037_v58 = vmul.f32 %v999_v19, %v946_v54  ;;  %v584_v32 = vmul.f32 %v547_v39, %v1869_v44 }
 0x18a   :  { %v879_v8 = vmul.f32 %v838_v59, %v786_v5 }
 0x18b   :  { %v738_v24 = vadd.f32 %v722_v42, %v581_v15 }
 0x18d   :  { %v895_v29 = vadd.f32 %v879_v8, %v738_v24 }
 0x18e   :  { %v842_v12 = vpop.permute.xlu1 %841  ;;  %v631_v13 = vpop.f32.mrf.mxu2 }
 0x18f   :  { %v1052_v30 = vadd.f32 %v1036_v23, %v895_v29  ;;  %v788_v35 = vpop.f32.mrf.mxu3  ;;  %v632_v63 = vadd.f32 %v1905_v61, %v631_v13  ;;  %v689_v41 = vpop.permute.xlu0 %688 }
 0x190   :  { %v789_v46 = vadd.f32 %v1915_v4, %v788_v35 }
 0x191   :  { %v1263_v17 = vpack.c.bf16 %v1052_v30, %v1051_v40  ;;  %v1007_v37 = vpop.permute.xlu2 %1006  ;;  %v723_v59 = vmul.f32 %v1988_v31, %v632_v63  ;;  %v948_v31 = vadd.f32 %v1932_v14, %v947_v21 }
 0x192   :  { %v880_v51 = vmul.f32 %v842_v12, %v789_v46 }
 0x193   :  { %1287 = vst [vmem:[#allocation8 + $0x18] sm:$0xff] %v1263_v17   ;;  %v739_v2 = vadd.f32 %v723_v59, %v582_v1 }
 0x195   :  { %v896_v50 = vadd.f32 %v880_v51, %v739_v2 }
 0x196   :  { %v633_v43 = vpop.f32.mrf.mxu2 }
 0x197   :  { %v542_v62 = vpop.permute.xlu1 %541  ;;  %v634_v9 = vadd.f32 %v1905_v61, %v633_v43  ;;  %v790_v56 = vpop.f32.mrf.mxu3  ;;  %v1053_v34 = vadd.f32 %v1037_v58, %v896_v50 }
 0x198   :  { %v583_v20 = vmul.f32 %v542_v62, %v1847_v33  ;;  %v791_v10 = vadd.f32 %v1915_v4, %v790_v56  ;;  %v850_v26 = vpop.permute.xlu0 %849  ;;  %v950_v33 = vpop.f32.mrf.mxu1 }
 0x199   :  { %v724_v60 = vmul.f32 %v689_v41, %v634_v9  ;;  %v951_v29 = vadd.f32 %v1932_v14, %v950_v33 }
 0x19a   :  { %v881_v52 = vmul.f32 %v846_v49, %v791_v10  ;;  %v697_v6 = vpop.permute.xlu2 %696 }
 0x19b   :  { %v740_v53 = vadd.f32 %v724_v60, %v583_v20  ;;  %v1039_v41 = vmul.f32 %v1007_v37, %v951_v29 }
 0x19d   :  { %v897_v16 = vadd.f32 %v881_v52, %v740_v53 }
 0x19f   :  { %v636_v25 = vpop.f32.mrf.mxu2 }
 0x1a0   :  { %v1003_v3 = vpop.permute.xlu1 %1002  ;;  %v793_v38 = vpop.f32.mrf.mxu3  ;;  %v637_v15 = vadd.f32 %v1905_v61, %v636_v25 }
 0x1a1   :  { %v1038_v11 = vmul.f32 %v1003_v3, %v948_v31  ;;  %v552_v42 = vpop.permute.xlu0 %551  ;;  %v794_v24 = vadd.f32 %v1915_v4, %v793_v38  ;;  %v952_v8 = vpop.f32.mrf.mxu1 }
 0x1a2   :  { %v585_v12 = vmul.f32 %v552_v42, %v1887_v55  ;;  %v953_v13 = vadd.f32 %v1932_v14, %v952_v8 }
 0x1a3   :  { %v1054_v47 = vadd.f32 %v1038_v11, %v897_v16  ;;  %v858_v7 = vpop.permute.xlu2 %857  ;;  %v882_v40 = vmul.f32 %v850_v26, %v794_v24 }
 0x1a5   :  { %v1268_v0 = vpack.c.bf16 %v1054_v47, %v1053_v34 }
 0x1a7   :  { %1288 = vst [vmem:[#allocation8 + $0x20] sm:$0xff] %v1268_v0   ;;  %v638_v5 = vpop.f32.mrf.mxu2 }
 0x1a8   :  { %v639_v49 = vadd.f32 %v1905_v61, %v638_v5  ;;  %v795_v19 = vpop.f32.mrf.mxu3 }
 0x1a9   :  { %v693_v18 = vpop.permute.xlu1 %692  ;;  %v796_v30 = vadd.f32 %v1915_v4, %v795_v19  ;;  %v1011_v35 = vpop.permute.xlu0 %1010 }
 0x1aa   :  { %v725_v22 = vmul.f32 %v693_v18, %v637_v15  ;;  %v726_v23 = vmul.f32 %v697_v6, %v639_v49  ;;  %v1040_v43 = vmul.f32 %v1011_v35, %v953_v13  ;;  %v955_v2 = vpop.f32.mrf.mxu1 }
 0x1ab   :  { %v956_v58 = vadd.f32 %v1932_v14, %v955_v2 }
 0x1ac   :  { %v741_v27 = vadd.f32 %v725_v22, %v584_v32  ;;  %v562_v63 = vpop.permute.xlu2 %561  ;;  %v742_v44 = vadd.f32 %v726_v23, %v585_v12 }
 0x1ad   :  { %v587_v16 = vmul.f32 %v562_v63, %v1852_v36 }
 0x1ae   :  { %v898_v17 = vadd.f32 %v882_v40, %v741_v27 }
 0x1af   :  { %v641_v46 = vpop.f32.mrf.mxu2 }
 0x1b0   :  { %v1055_v62 = vadd.f32 %v1039_v41, %v898_v17  ;;  %v798_v60 = vpop.f32.mrf.mxu3  ;;  %v642_v54 = vadd.f32 %v1905_v61, %v641_v46 }
 0x1b1   :  { %v701_v21 = vpop.permute.xlu0 %700  ;;  %v799_v6 = vadd.f32 %v1915_v4, %v798_v60 }
 0x1b2   :  { %v854_v48 = vpop.permute.xlu1 %853  ;;  %v957_v50 = vpop.f32.mrf.mxu1  ;;  %v727_v52 = vmul.f32 %v701_v21, %v642_v54 }
 0x1b3   :  { %v883_v39 = vmul.f32 %v854_v48, %v796_v30  ;;  %v958_v47 = vadd.f32 %v1932_v14, %v957_v50  ;;  %v884_v38 = vmul.f32 %v858_v7, %v799_v6 }
 0x1b5   :  { %v899_v59 = vadd.f32 %v883_v39, %v742_v44  ;;  %v709_v1 = vpop.permute.xlu2 %708 }
 0x1b7   :  { %v1056_v9 = vadd.f32 %v1040_v43, %v899_v59  ;;  %v643_v51 = vpop.f32.mrf.mxu2 }
 0x1b8   :  { %v800_v53 = vpop.f32.mrf.mxu3  ;;  %v644_v25 = vadd.f32 %v1905_v61, %v643_v51 }
 0x1b9   :  { %v1273_v56 = vpack.c.bf16 %v1056_v9, %v1055_v62  ;;  %v862_v31 = vpop.permute.xlu0 %861  ;;  %v801_v26 = vadd.f32 %v1915_v4, %v800_v53 }
 0x1ba   :  { %v960_v36 = vpop.f32.mrf.mxu1 }
 0x1bb   :  { %1289 = vst [vmem:[#allocation8 + $0x28] sm:$0xff] %v1273_v56   ;;  %v557_v55 = vpop.permute.xlu1 %556  ;;  %v961_v9 = vadd.f32 %v1932_v14, %v960_v36 }
 0x1bc   :  { %v586_v37 = vmul.f32 %v557_v55, %v1834_v28  ;;  %v885_v28 = vmul.f32 %v862_v31, %v801_v26 }
 0x1be   :  { %v870_v10 = vpop.permute.xlu2 %869  ;;  %v743_v11 = vadd.f32 %v727_v52, %v586_v37 }
 0x1bf   :  { %v646_v15 = vpop.f32.mrf.mxu2 }
 0x1c0   :  { %v900_v18 = vadd.f32 %v884_v38, %v743_v11  ;;  %v803_v8 = vpop.f32.mrf.mxu3  ;;  %v647_v12 = vadd.f32 %v1905_v61, %v646_v15 }
 0x1c1   :  { %v567_v22 = vpop.permute.xlu0 %566  ;;  %v804_v35 = vadd.f32 %v1915_v4, %v803_v8 }
 0x1c2   :  { %v729_v30 = vmul.f32 %v709_v1, %v647_v12  ;;  %v588_v17 = vmul.f32 %v567_v22, %v1872_v45  ;;  %v962_v41 = vpop.f32.mrf.mxu1 }
 0x1c4   :  { %v1015_v20 = vpop.permute.xlu1 %1014  ;;  %v745_v43 = vadd.f32 %v729_v30, %v588_v17 }
 0x1c5   :  { %v1041_v0 = vmul.f32 %v1015_v20, %v956_v58 }
 0x1c7   :  { %v1019_v33 = vpop.permute.xlu2 %1018  ;;  %v1057_v32 = vadd.f32 %v1041_v0, %v900_v18  ;;  %v648_v29 = vpop.f32.mrf.mxu2 }
 0x1c8   :  { %v1042_v42 = vmul.f32 %v1019_v33, %v958_v47  ;;  %v649_v7 = vadd.f32 %v1905_v61, %v648_v29  ;;  %v805_v40 = vpop.f32.mrf.mxu3  ;;  %v963_v61 = vadd.f32 %v1932_v14, %v962_v41 }
 0x1c9   :  { %v713_v27 = vpop.permute.xlu0 %712  ;;  %v806_v44 = vadd.f32 %v1915_v4, %v805_v40 }
 0x1ca   :  { %v730_v63 = vmul.f32 %v713_v27, %v649_v7 }
 0x1cb   :  { %v887_v56 = vmul.f32 %v870_v10, %v806_v44 }
 0x1cd   :  { %v705_v3 = vpop.permute.xlu1 %704 }
 0x1ce   :  { %v728_v34 = vmul.f32 %v705_v3, %v644_v25 }
 0x1d0   :  { %v744_v5 = vadd.f32 %v728_v34, %v587_v16 }
 0x1d1   :  { %v1023_v62 = vpop.permute.xlu0 %1022 }
 0x1d2   :  { %v901_v49 = vadd.f32 %v885_v28, %v744_v5  ;;  %v1043_v46 = vmul.f32 %v1023_v62, %v961_v9 }
 0x1d4   :  { %v1058_v24 = vadd.f32 %v1042_v42, %v901_v49 }
 0x1d6   :  { %v1278_v19 = vpack.c.bf16 %v1058_v24, %v1057_v32  ;;  %v866_v23 = vpop.permute.xlu1 %865 }
 0x1d7   :  { %v886_v39 = vmul.f32 %v866_v23, %v804_v35 }
 0x1d8   :  { %1290 = vst [vmem:[#allocation8 + $0x30] sm:$0xff] %v1278_v19  }
 0x1d9   :  { %v902_v1 = vadd.f32 %v886_v39, %v745_v43 }
 0x1db   :  { %v1059_v45 = vadd.f32 %v1043_v46, %v902_v1 }
 0x1df   :  { %v572_v13 = vpop.permute.xlu1 %571 }
 0x1e0   :  { %v589_v48 = vmul.f32 %v572_v13, %v1890_v57 }
 0x1e2   :  { %v746_v59 = vadd.f32 %v730_v63, %v589_v48 }
 0x1e4   :  { %v903_v60 = vadd.f32 %v887_v56, %v746_v59 }
 0x1e8   :  { %v1027_v55 = vpop.permute.xlu1 %1026 }
 0x1e9   :  { %v1044_v57 = vmul.f32 %v1027_v55, %v963_v61 }
 0x1eb   :  { %v1060_v4 = vadd.f32 %v1044_v57, %v903_v60 }
 0x1ed   :  { %v1283_v21 = vpack.c.bf16 %v1060_v4, %v1059_v45 }
 0x1ef   :  { %1291 = vst [vmem:[#allocation8 + $0x38] sm:$0xff] %v1283_v21  }
 0x1f0   :  { %1105 = dma.vmem_to_hbm [thread:$0]  %s1098_s9, 1024, %s1100_s0, [#allocation4], %s1490_s12, %s1490_s12, %s1491_s13  }
 0x1f1   :  { %1478 = dma.done.wait [#allocation4], 1024  }
 0x1f2   :  { %1479 = vsyncadd [#allocation4], 4294966272 }
 0x1f3   :  { %1110 = vsyncpa [#allocation3], 1 }
 0x1f4   :  { %1111 = vsyncpa [#allocation6], 1 }
 0x1f5   :  { %1112 = vsyncpa [#allocation4], 1 }

</bundles_post_ra>
